<compile_context>
chip_gen: v5e
topology: v5e:2x2
jax: 0.10.0
libtpu: 0.0.40
codegen_flags: <defaults>
</compile_context>

<pallas_src>
import functools

import numpy as np
import jax
import jax.numpy as jnp
from jax.experimental import pallas as pl
from jax.experimental.pallas import tpu as pltpu

# Plain Python float (not a jnp array) so the kernel captures no constants.
F32_EPS = float(np.finfo(np.float32).eps)


def _round_up(n, m):
    return ((n + m - 1) // m) * m


def _fake_quant(t):
    """General per-tensor affine fake quantization, quint8, qmin=0, qmax=255."""
    t_min = jnp.minimum(jnp.min(t), 0.0)
    t_max = jnp.maximum(jnp.max(t), 0.0)
    scale = jnp.maximum((t_max - t_min) / 255.0, F32_EPS)
    inv_scale = 1.0 / scale                      # exact scalar reciprocal
    zp = jnp.clip(jnp.round(-t_min / scale), 0.0, 255.0)
    q = jnp.clip(jnp.round(t * inv_scale + zp), 0.0, 255.0)
    return (q - zp) * scale


def dfr_rollout_kernel(x_ref, mask_fq_ref, prev_ref, out_ref, state_s, *, t_chunk):
    # grid = (batch_tiles, time_chunks); time is the inner (state-carrying) axis.
    c = pl.program_id(1)

    @pl.when(c == 0)
    def _init():
        # New batch tile (or very first chunk): load the initial state.
        state_s[...] = prev_ref[...]

    # Hoisted off the serial chain: x_t * FakeQuant(mask) for ALL steps of the
    # chunk at once.  (Bt,1)x(1,Hp) outer product == VPU broadcast multiply.
    vec_x = x_ref[...] * mask_fq_ref[...][None]          # (Tt, Bt, Hp)

    state = state_s[...]
    # Small static unroll over the chunk; the recurrence itself is serial in t.
    for t in range(t_chunk):
        out = jnp.maximum(vec_x[t] + 0.125 * state, 0.0)  # ReLU
        # Post-ReLU fake-quant: t >= 0 => min_neg = 0, zero_point = 0 (exact).
        scale = jnp.maximum(jnp.max(out) * (1.0 / 255.0), F32_EPS)
        inv_scale = 1.0 / scale                           # exact scalar recip
        out = jnp.clip(jnp.round(out * inv_scale), 0.0, 255.0) * scale
        out_ref[t] = out                                  # lane-dense store
        state = out
    state_s[...] = state                                  # carry across chunks


def ori_qdfr_cell_rollout(xs, mask, prev_output, *, t_chunk=8, b_tile=8):
    """Run T steps of OriQDFRCell in one fused pallas_call.

    xs:          (T, B) float32  -- drive input per step
    mask:        (1, H) float32  -- constant parameter
    prev_output: (B, H) float32  -- initial recurrent state
    returns (outputs (T, B, H), final_state (B, H))
    """
    xs = jnp.asarray(xs, jnp.float32)
    mask = jnp.asarray(mask, jnp.float32)
    prev_output = jnp.asarray(prev_output, jnp.float32)

    T, B = xs.shape
    H = mask.shape[1]

    Hp = _round_up(H, 128)                    # lane-dense output stores
    Bp = _round_up(B, 8)                      # sublane alignment
    Bt = min(_round_up(b_tile, 8), Bp)        # batch tile (parallel grid axis)
    Bp = _round_up(Bp, Bt)
    Tt = min(t_chunk, T)                      # timesteps fused per grid step
    Tp = _round_up(T, Tt)

    # FakeQuant(mask) hoisted to XLA (constant parameter); zero-padding is
    # exact (min clamps to 0, max >= 0, FakeQuant(0) == 0).
    mask_fq = jnp.pad(_fake_quant(mask), ((0, 0), (0, Hp - H)))    # (1, Hp)
    x3 = jnp.pad(xs, ((0, Tp - T), (0, Bp - B)))[..., None]        # (Tp, Bp, 1)
    prev_p = jnp.pad(prev_output, ((0, Bp - B), (0, Hp - H)))      # (Bp, Hp)

    out = pl.pallas_call(
        functools.partial(dfr_rollout_kernel, t_chunk=Tt),
        out_shape=jax.ShapeDtypeStruct((Tp, Bp, Hp), jnp.float32),
        grid_spec=pltpu.PrefetchScalarGridSpec(
            num_scalar_prefetch=0,
            grid=(Bp // Bt, Tp // Tt),
            in_specs=[
                # x streamed per (chunk, batch-tile): tiny, double-buffered.
                pl.BlockSpec((Tt, Bt, 1), lambda b, c: (c, b, 0)),
                pl.BlockSpec((1, Hp), lambda b, c: (0, 0)),
                pl.BlockSpec((Bt, Hp), lambda b, c: (b, 0)),
            ],
            out_specs=pl.BlockSpec((Tt, Bt, Hp), lambda b, c: (c, b, 0)),
            scratch_shapes=[
                pltpu.VMEM((Bt, Hp), jnp.float32),   # recurrent state
            ],
        ),
        compiler_params=pltpu.CompilerParams(
            # Batch tiles are independent (megacore on v7x); time carries state.
            dimension_semantics=("parallel", "arbitrary"),
        ),
    )(x3, mask_fq, prev_p)

    outs = out[:T, :B, :H]
    return outs, outs[-1]


def ori_qdfr_cell(x, mask, prev_output):
    """Single-step forward, exactly the PyTorch module's forward().

    x: (B,), mask: (1, H), prev_output: (B, H) -> (output, output), each (B, H).
    """
    xs = jnp.asarray(x, jnp.float32)[None, :]     # T = 1
    outs, _ = ori_qdfr_cell_rollout(xs, mask, prev_output, t_chunk=1)
    out = outs[0]
    return out, out


def _reference_rollout(xs, mask, prev_output):
    """Pure-JAX step-by-step reference using the GENERAL fake-quant formula
    (validates the in-kernel zero-point-0 specialization)."""
    mask_fq = _fake_quant(jnp.asarray(mask, jnp.float32))
    state = jnp.asarray(prev_output, jnp.float32)
    outs = []
    for t in range(xs.shape[0]):
        vec_x = xs[t][:, None] * mask_fq
        out = jnp.maximum(vec_x + 0.125 * state, 0.0)
        out = _fake_quant(out)
        outs.append(out)
        state = out
    return jnp.stack(outs), state


if __name__ == "__main__":
    # Small shapes; T/B intentionally NOT multiples of the tile sizes so the
    # padding paths are exercised.
    T, B, n_hidden = 10, 6, 32

    key = jax.random.PRNGKey(0)
    k_mask, k_x, k_prev = jax.random.split(key, 3)

    # nn.init.uniform_(self.mask, a=-0.5, b=0.5)
    mask = jax.random.uniform(k_mask, (1, n_hidden), jnp.float32,
                              minval=-0.5, maxval=0.5)
    xs = jax.random.normal(k_x, (T, B), jnp.float32)
    prev_output = jax.random.normal(k_prev, (B, n_hidden), jnp.float32)

    # Fused multi-chunk rollout in a single pallas_call.
    outs, final_state = ori_qdfr_cell_rollout(xs, mask, prev_output,
                                              t_chunk=4, b_tile=8)
    jax.block_until_ready(outs)

    ref_outs, ref_state = _reference_rollout(xs, mask, prev_output)
    np.testing.assert_allclose(np.asarray(outs), np.asarray(ref_outs),
                               rtol=1e-5, atol=1e-5)
    np.testing.assert_allclose(np.asarray(final_state), np.asarray(ref_state),
                               rtol=1e-5, atol=1e-5)

    # Single-step API == the module's forward().
    out1, state1 = ori_qdfr_cell(xs[0], mask, prev_output)
    jax.block_until_ready(out1)
    np.testing.assert_allclose(np.asarray(out1), np.asarray(ref_outs[0]),
                               rtol=1e-5, atol=1e-5)

    print("KERNEL_OK")
</pallas_src>

<mosaic_0001>
module attributes {stable_mosaic.version = 11 : i64} {
  func.func @dfr_rollout_kernel(%arg0: i32, %arg1: i32, %arg2: memref<4x8x1xf32, #tpu.memory_space<vmem>>, %arg3: memref<1x128xf32, #tpu.memory_space<vmem>>, %arg4: memref<8x128xf32, #tpu.memory_space<vmem>>, %arg5: memref<4x8x128xf32, #tpu.memory_space<vmem>>, %arg6: memref<8x128xf32, #tpu.memory_space<vmem>>) attributes {dimension_semantics = [#tpu.dimension_semantics<parallel>, #tpu.dimension_semantics<arbitrary>], iteration_bounds = array<i64: 1, 3>, scalar_prefetch = 0 : i64, scratch_operands = 1 : i64, tpu.core_type = #tpu.core_type<tc>, window_params = [{transform_indices = @transform_0, window_bounds = array<i64: 4, 8, 1>}, {pipeline_mode = #tpu.pipeline_mode<synchronous>, transform_indices = @transform_1, window_bounds = array<i64: 1, 128>}, {transform_indices = @transform_2, window_bounds = array<i64: 8, 128>}, {transform_indices = @transform_3, window_bounds = array<i64: 4, 8, 128>}]} {
    %c0_i32 = arith.constant 0 : i32
    %0 = arith.cmpi eq, %arg1, %c0_i32 : i32
    %1 = arith.extui %0 : i1 to i32
    %c0_i32_0 = arith.constant 0 : i32
    %2 = arith.cmpi ne, %1, %c0_i32_0 : i32
    scf.if %2 {
      %c0_49 = arith.constant 0 : index
      %c0_50 = arith.constant 0 : index
      %115 = vector.load %arg4[%c0_49, %c0_50] : memref<8x128xf32, #tpu.memory_space<vmem>>, vector<8x128xf32>
      %c0_51 = arith.constant 0 : index
      %c0_52 = arith.constant 0 : index
      %116 = vector.load %arg6[%c0_51, %c0_52] : memref<8x128xf32, #tpu.memory_space<vmem>>, vector<8x128xf32>
      tpu.vector_store %arg6[%c0_51, %c0_52], %115 {strides = array<i32>} : memref<8x128xf32, #tpu.memory_space<vmem>>, vector<8x128xf32>,
    } else {
    }
    %c0 = arith.constant 0 : index
    %c0_1 = arith.constant 0 : index
    %c0_2 = arith.constant 0 : index
    %3 = vector.load %arg2[%c0, %c0_1, %c0_2] : memref<4x8x1xf32, #tpu.memory_space<vmem>>, vector<4x8x1xf32>
    %c0_3 = arith.constant 0 : index
    %c0_4 = arith.constant 0 : index
    %4 = vector.load %arg3[%c0_3, %c0_4] : memref<1x128xf32, #tpu.memory_space<vmem>>, vector<1x128xf32>
    %5 = vector.shape_cast %4 : vector<1x128xf32> to vector<1x1x128xf32>
    %6 = vector.broadcast %3 : vector<4x8x1xf32> to vector<4x8x128xf32>
    %7 = vector.broadcast %5 : vector<1x1x128xf32> to vector<4x8x128xf32>
    %8 = arith.mulf %6, %7 : vector<4x8x128xf32>
    %c0_5 = arith.constant 0 : index
    %c0_6 = arith.constant 0 : index
    %9 = vector.load %arg6[%c0_5, %c0_6] : memref<8x128xf32, #tpu.memory_space<vmem>>, vector<8x128xf32>
    %10 = vector.extract_strided_slice %8 {offsets = [0, 0, 0], sizes = [1, 8, 128], strides = [1, 1, 1]} : vector<4x8x128xf32> to vector<1x8x128xf32>
    %11 = vector.shape_cast %10 : vector<1x8x128xf32> to vector<8x128xf32>
    %cst = arith.constant 1.250000e-01 : f32
    %12 = vector.broadcast %cst : f32 to vector<8x128xf32>
    %13 = arith.mulf %12, %9 : vector<8x128xf32>
    %14 = arith.addf %11, %13 : vector<8x128xf32>
    %cst_7 = arith.constant 0.000000e+00 : f32
    %15 = vector.broadcast %cst_7 : f32 to vector<8x128xf32>
    %16 = arith.maximumf %14, %15 : vector<8x128xf32>
    %17 = vector.shape_cast %16 : vector<8x128xf32> to vector<1x8x128xf32>
    %cst_8 = arith.constant dense<0xFF800000> : vector<1xf32>
    %18 = vector.multi_reduction <maximumf>, %17, %cst_8 [1, 2] : vector<1x8x128xf32> to vector<1xf32>
    %19 = vector.shape_cast %18 : vector<1xf32> to vector<1x1x1xf32>
    %20 = vector.extract %19[0, 0, 0] : f32 from vector<1x1x1xf32>
    %cst_9 = arith.constant 0.00392156886 : f32
    %21 = arith.mulf %20, %cst_9 : f32
    %cst_10 = arith.constant 1.1920929E-7 : f32
    %22 = arith.maximumf %21, %cst_10 : f32
    %cst_11 = arith.constant 1.000000e+00 : f32
    %23 = arith.divf %cst_11, %22 : f32
    %24 = vector.broadcast %23 : f32 to vector<8x128xf32>
    %25 = arith.mulf %16, %24 : vector<8x128xf32>
    %26 = math.roundeven %25 : vector<8x128xf32>
    %cst_12 = arith.constant 0.000000e+00 : f32
    %cst_13 = arith.constant 2.550000e+02 : f32
    %27 = vector.broadcast %cst_12 : f32 to vector<8x128xf32>
    %28 = arith.maximumf %27, %26 : vector<8x128xf32>
    %29 = vector.broadcast %cst_13 : f32 to vector<8x128xf32>
    %30 = arith.minimumf %29, %28 : vector<8x128xf32>
    %31 = vector.broadcast %22 : f32 to vector<8x128xf32>
    %32 = arith.mulf %30, %31 : vector<8x128xf32>
    %c0_14 = arith.constant 0 : index
    %c0_15 = arith.constant 0 : index
    %c0_16 = arith.constant 0 : index
    %33 = vector.load %arg5[%c0_14, %c0_15, %c0_16] : memref<4x8x128xf32, #tpu.memory_space<vmem>>, vector<1x8x128xf32>
    %34 = vector.shape_cast %33 : vector<1x8x128xf32> to vector<8x128xf32>
    %35 = vector.shape_cast %32 : vector<8x128xf32> to vector<1x8x128xf32>
    tpu.vector_store %arg5[%c0_14, %c0_15, %c0_16], %35 {strides = array<i32>} : memref<4x8x128xf32, #tpu.memory_space<vmem>>, vector<1x8x128xf32>,
    %36 = vector.extract_strided_slice %8 {offsets = [1, 0, 0], sizes = [1, 8, 128], strides = [1, 1, 1]} : vector<4x8x128xf32> to vector<1x8x128xf32>
    %37 = vector.shape_cast %36 : vector<1x8x128xf32> to vector<8x128xf32>
    %cst_17 = arith.constant 1.250000e-01 : f32
    %38 = vector.broadcast %cst_17 : f32 to vector<8x128xf32>
    %39 = arith.mulf %38, %32 : vector<8x128xf32>
    %40 = arith.addf %37, %39 : vector<8x128xf32>
    %cst_18 = arith.constant 0.000000e+00 : f32
    %41 = vector.broadcast %cst_18 : f32 to vector<8x128xf32>
    %42 = arith.maximumf %40, %41 : vector<8x128xf32>
    %43 = vector.shape_cast %42 : vector<8x128xf32> to vector<1x8x128xf32>
    %cst_19 = arith.constant dense<0xFF800000> : vector<1xf32>
    %44 = vector.multi_reduction <maximumf>, %43, %cst_19 [1, 2] : vector<1x8x128xf32> to vector<1xf32>
    %45 = vector.shape_cast %44 : vector<1xf32> to vector<1x1x1xf32>
    %46 = vector.extract %45[0, 0, 0] : f32 from vector<1x1x1xf32>
    %cst_20 = arith.constant 0.00392156886 : f32
    %47 = arith.mulf %46, %cst_20 : f32
    %cst_21 = arith.constant 1.1920929E-7 : f32
    %48 = arith.maximumf %47, %cst_21 : f32
    %cst_22 = arith.constant 1.000000e+00 : f32
    %49 = arith.divf %cst_22, %48 : f32
    %50 = vector.broadcast %49 : f32 to vector<8x128xf32>
    %51 = arith.mulf %42, %50 : vector<8x128xf32>
    %52 = math.roundeven %51 : vector<8x128xf32>
    %cst_23 = arith.constant 0.000000e+00 : f32
    %cst_24 = arith.constant 2.550000e+02 : f32
    %53 = vector.broadcast %cst_23 : f32 to vector<8x128xf32>
    %54 = arith.maximumf %53, %52 : vector<8x128xf32>
    %55 = vector.broadcast %cst_24 : f32 to vector<8x128xf32>
    %56 = arith.minimumf %55, %54 : vector<8x128xf32>
    %57 = vector.broadcast %48 : f32 to vector<8x128xf32>
    %58 = arith.mulf %56, %57 : vector<8x128xf32>
    %c1 = arith.constant 1 : index
    %c0_25 = arith.constant 0 : index
    %c0_26 = arith.constant 0 : index
    %59 = vector.load %arg5[%c1, %c0_25, %c0_26] : memref<4x8x128xf32, #tpu.memory_space<vmem>>, vector<1x8x128xf32>
    %60 = vector.shape_cast %59 : vector<1x8x128xf32> to vector<8x128xf32>
    %61 = vector.shape_cast %58 : vector<8x128xf32> to vector<1x8x128xf32>
    tpu.vector_store %arg5[%c1, %c0_25, %c0_26], %61 {strides = array<i32>} : memref<4x8x128xf32, #tpu.memory_space<vmem>>, vector<1x8x128xf32>,
    %62 = vector.extract_strided_slice %8 {offsets = [2, 0, 0], sizes = [1, 8, 128], strides = [1, 1, 1]} : vector<4x8x128xf32> to vector<1x8x128xf32>
    %63 = vector.shape_cast %62 : vector<1x8x128xf32> to vector<8x128xf32>
    %cst_27 = arith.constant 1.250000e-01 : f32
    %64 = vector.broadcast %cst_27 : f32 to vector<8x128xf32>
    %65 = arith.mulf %64, %58 : vector<8x128xf32>
    %66 = arith.addf %63, %65 : vector<8x128xf32>
    %cst_28 = arith.constant 0.000000e+00 : f32
    %67 = vector.broadcast %cst_28 : f32 to vector<8x128xf32>
    %68 = arith.maximumf %66, %67 : vector<8x128xf32>
    %69 = vector.shape_cast %68 : vector<8x128xf32> to vector<1x8x128xf32>
    %cst_29 = arith.constant dense<0xFF800000> : vector<1xf32>
    %70 = vector.multi_reduction <maximumf>, %69, %cst_29 [1, 2] : vector<1x8x128xf32> to vector<1xf32>
    %71 = vector.shape_cast %70 : vector<1xf32> to vector<1x1x1xf32>
    %72 = vector.extract %71[0, 0, 0] : f32 from vector<1x1x1xf32>
    %cst_30 = arith.constant 0.00392156886 : f32
    %73 = arith.mulf %72, %cst_30 : f32
    %cst_31 = arith.constant 1.1920929E-7 : f32
    %74 = arith.maximumf %73, %cst_31 : f32
    %cst_32 = arith.constant 1.000000e+00 : f32
    %75 = arith.divf %cst_32, %74 : f32
    %76 = vector.broadcast %75 : f32 to vector<8x128xf32>
    %77 = arith.mulf %68, %76 : vector<8x128xf32>
    %78 = math.roundeven %77 : vector<8x128xf32>
    %cst_33 = arith.constant 0.000000e+00 : f32
    %cst_34 = arith.constant 2.550000e+02 : f32
    %79 = vector.broadcast %cst_33 : f32 to vector<8x128xf32>
    %80 = arith.maximumf %79, %78 : vector<8x128xf32>
    %81 = vector.broadcast %cst_34 : f32 to vector<8x128xf32>
    %82 = arith.minimumf %81, %80 : vector<8x128xf32>
    %83 = vector.broadcast %74 : f32 to vector<8x128xf32>
    %84 = arith.mulf %82, %83 : vector<8x128xf32>
    %c2 = arith.constant 2 : index
    %c0_35 = arith.constant 0 : index
    %c0_36 = arith.constant 0 : index
    %85 = vector.load %arg5[%c2, %c0_35, %c0_36] : memref<4x8x128xf32, #tpu.memory_space<vmem>>, vector<1x8x128xf32>
    %86 = vector.shape_cast %85 : vector<1x8x128xf32> to vector<8x128xf32>
    %87 = vector.shape_cast %84 : vector<8x128xf32> to vector<1x8x128xf32>
    tpu.vector_store %arg5[%c2, %c0_35, %c0_36], %87 {strides = array<i32>} : memref<4x8x128xf32, #tpu.memory_space<vmem>>, vector<1x8x128xf32>,
    %88 = vector.extract_strided_slice %8 {offsets = [3, 0, 0], sizes = [1, 8, 128], strides = [1, 1, 1]} : vector<4x8x128xf32> to vector<1x8x128xf32>
    %89 = vector.shape_cast %88 : vector<1x8x128xf32> to vector<8x128xf32>
    %cst_37 = arith.constant 1.250000e-01 : f32
    %90 = vector.broadcast %cst_37 : f32 to vector<8x128xf32>
    %91 = arith.mulf %90, %84 : vector<8x128xf32>
    %92 = arith.addf %89, %91 : vector<8x128xf32>
    %cst_38 = arith.constant 0.000000e+00 : f32
    %93 = vector.broadcast %cst_38 : f32 to vector<8x128xf32>
    %94 = arith.maximumf %92, %93 : vector<8x128xf32>
    %95 = vector.shape_cast %94 : vector<8x128xf32> to vector<1x8x128xf32>
    %cst_39 = arith.constant dense<0xFF800000> : vector<1xf32>
    %96 = vector.multi_reduction <maximumf>, %95, %cst_39 [1, 2] : vector<1x8x128xf32> to vector<1xf32>
    %97 = vector.shape_cast %96 : vector<1xf32> to vector<1x1x1xf32>
    %98 = vector.extract %97[0, 0, 0] : f32 from vector<1x1x1xf32>
    %cst_40 = arith.constant 0.00392156886 : f32
    %99 = arith.mulf %98, %cst_40 : f32
    %cst_41 = arith.constant 1.1920929E-7 : f32
    %100 = arith.maximumf %99, %cst_41 : f32
    %cst_42 = arith.constant 1.000000e+00 : f32
    %101 = arith.divf %cst_42, %100 : f32
    %102 = vector.broadcast %101 : f32 to vector<8x128xf32>
    %103 = arith.mulf %94, %102 : vector<8x128xf32>
    %104 = math.roundeven %103 : vector<8x128xf32>
    %cst_43 = arith.constant 0.000000e+00 : f32
    %cst_44 = arith.constant 2.550000e+02 : f32
    %105 = vector.broadcast %cst_43 : f32 to vector<8x128xf32>
    %106 = arith.maximumf %105, %104 : vector<8x128xf32>
    %107 = vector.broadcast %cst_44 : f32 to vector<8x128xf32>
    %108 = arith.minimumf %107, %106 : vector<8x128xf32>
    %109 = vector.broadcast %100 : f32 to vector<8x128xf32>
    %110 = arith.mulf %108, %109 : vector<8x128xf32>
    %c3 = arith.constant 3 : index
    %c0_45 = arith.constant 0 : index
    %c0_46 = arith.constant 0 : index
    %111 = vector.load %arg5[%c3, %c0_45, %c0_46] : memref<4x8x128xf32, #tpu.memory_space<vmem>>, vector<1x8x128xf32>
    %112 = vector.shape_cast %111 : vector<1x8x128xf32> to vector<8x128xf32>
    %113 = vector.shape_cast %110 : vector<8x128xf32> to vector<1x8x128xf32>
    tpu.vector_store %arg5[%c3, %c0_45, %c0_46], %113 {strides = array<i32>} : memref<4x8x128xf32, #tpu.memory_space<vmem>>, vector<1x8x128xf32>,
    %c0_47 = arith.constant 0 : index
    %c0_48 = arith.constant 0 : index
    %114 = vector.load %arg6[%c0_47, %c0_48] : memref<8x128xf32, #tpu.memory_space<vmem>>, vector<8x128xf32>
    tpu.vector_store %arg6[%c0_47, %c0_48], %110 {strides = array<i32>} : memref<8x128xf32, #tpu.memory_space<vmem>>, vector<8x128xf32>,
    return
  }
  func.func @transform_0(%arg0: i32, %arg1: i32) -> (i32, i32, i32) {
    %c0_i32 = arith.constant 0 : i32
    %c0_i32_0 = arith.constant 0 : i32
    return %arg1, %arg0, %c0_i32 : i32, i32, i32
  }
  func.func @transform_1(%arg0: i32, %arg1: i32) -> (i32, i32) {
    %c0_i32 = arith.constant 0 : i32
    %c0_i32_0 = arith.constant 0 : i32
    %c0_i32_1 = arith.constant 0 : i32
    return %c0_i32, %c0_i32_0 : i32, i32
  }
  func.func @transform_2(%arg0: i32, %arg1: i32) -> (i32, i32) {
    %c0_i32 = arith.constant 0 : i32
    %c0_i32_0 = arith.constant 0 : i32
    return %arg0, %c0_i32 : i32, i32
  }
  func.func @transform_3(%arg0: i32, %arg1: i32) -> (i32, i32, i32) {
    %c0_i32 = arith.constant 0 : i32
    %c0_i32_0 = arith.constant 0 : i32
    return %arg1, %arg0, %c0_i32 : i32, i32, i32
  }
}

</mosaic_0001>

<bundles_post_ra>
// kernel: tpu_custom_call.1
= control target key start
LH: loop header
LB: loop body
LE: loop exit
PB: predicated region body
PF: predicated region fallthrough
CT: control target
= control target key end

     0   :  { %8 = vsyncpa [#allocation4], 0  ;;  %s888_s0 = inlined_call_operand.vmem [shape: f32[12,8,1], index: 0, kind: input, shape index: {}]   ;;  %s889_s1 = inlined_call_operand.vmem [shape: f32[1,128], index: 1, kind: input, shape index: {}]   ;;  %s890_s2 = inlined_call_operand.vmem [shape: f32[8,128], index: 2, kind: input, shape index: {}]   ;;  %s891_s3 = inlined_call_operand.hbm [shape: f32[12,8,128], index: 3, kind: output, shape index: {}]  }
   0x1   :  { %10 = vsyncpa [#allocation4 + $0x1], 0  ;;  %s758_s12 = smov 0   ;;  %s760_s13 = smov 0  }
   0x2   :  { %s762_s14 = smov 0   ;;  %s764_s15 = smov 0  }
   0x3   :  { %s766_s16 = smov 0   ;;  %s768_s17 = smov 0  }
   0x4 LB: > { %s516_s18 = sadd.s32 4294967295, %s732_s17   ;;  %s517_s19 = sadd.s32 4294967294, %s732_s17   ;;  %s732_s17 = sphi %s768_s17, %s16_s17   ;;  %s728_s16 = sphi %s766_s16, %s898_s16   ;;  %s724_s15 = sphi %s764_s15, %s897_s15   ;;  %s720_s14 = sphi %s762_s14, %s896_s14   ;;  %s716_s13 = sphi %s760_s13, %s895_s13   ;;  %s712_s12 = sphi %s758_s12, %s894_s12  }
   0x5   : > { %s25_s20 = sadd.s32 1, %s728_s16  ;;  %s112_s21 = sadd.s32 1, %s720_s14 }
   0x6   : > { %p26_p0 = scmp.ge.s32.totalorder %s25_s20, 3  ;;  %p122_p1 = scmp.ne.s32.totalorder %s720_s14, %s716_s13 }
   0x7   : > { %p123_p2 = scmp.eq.s32.totalorder %s516_s18, 2  ;;  %p128_p3 = scmp.ne.s32.totalorder %s716_s13, %s712_s12 }
   0x8   : > { %s900_s20 = smov (%p26_p0, %s25_s20), 0  ;;  %p129_p5 = scmp.eq.s32.totalorder %s517_s19, 2 }
   0x9   : > { %p798_p4 = por %p123_p2, %p122_p1  ;;  %s107_s23 = ssub.s32 %s728_s16, %s900_s20 }
   0xa   : > { %p521_p6 = scmp.ge.s32.totalorder %s732_s17, 1  ;;  %p110_p7 = scmp.eq.s32.totalorder %s107_s23, 0 }
   0xb   : > { %p805_p8 = por %p129_p5, %p128_p3  ;;  %p169_p9 = scmp.lt.s32.totalorder %s732_s17, 4 }
   0xc   : > { %s811_s25 = scalar_select %p110_p7, %s720_s14, %s112_s21  }
   0xd   : > { %p170_p10 = pnand %p521_p6, %p169_p9 }
   0xe   : > { %s197_s26 = sand.u32 (!%p170_p10), 1, %s716_s13   ;;  %s523_s27 = sshll.u32 (!%p170_p10), %s724_s15, 2 }
   0xf   : > { %173 = sbr.rel (%p170_p10) target bundleno = 1241 (0x4d9), region = 32  ;;  %s522_s28 = sshll.u32 (!%p170_p10), %s197_s26, 5 }
  0x10   : > { %p201_p11 = scmp.lt.s32.totalorder (!%p170_p10), %s523_s27, 11  ;;  %s822_s6 = scalar_lea.vmem (!%p170_p10), [#allocation3], %s522_s28 }
  0x11   : > { %p525_p12 = scmp.ne.s32.totalorder (!%p170_p10), %s724_s15, 0 }
  0x14   : > { %s902_s27 = smov (!%p201_p11, %s523_s27), 11  ;;  %217 = sbr.rel (%p525_p12) target bundleno = 27 (0x1b), region = 36 }
  0x15   : > { %s524_s29 = sshll.u32 %s902_s27, 3 }
  0x16   : > { %s820_s5 = scalar_lea.vmem %s888_s0, %s524_s29 }
  0x19   : > { %v218_v0 = vld [vmem:[%s890_s2] sm:$0xff] }
  0x1a   : > { %219 = vst [vmem:[#allocation2] sm:$0xff] %v218_v0 }
  0x1b PF: > { %v220_v1 = vld [vmem:[%s820_s5] sm:$0xff]  ;;  %v734_v2 = vmov 0   ;;  %v221_v10 = vld [vmem:[%s820_s5 + $0x8] sm:$0xff]  ;;  %s735_s19 = smov 1.1920929e-07   ;;  %v222_v46 = vld [vmem:[%s820_s5 + $0x10] sm:$0xff] }
  0x1c   : > { %642 = vset.pattern.permute.xlu0 %v734_v2  ;;  %643 = vset.pattern.permute.xlu1 %v734_v2  ;;  %v832_v4 = vld [vmem:[%s889_s1] ss:$0 sm:$0xff] }
  0x1d   : > { %227 = vperm.xlu0 %642, %v220_v1   ;;  %644 = vset.pattern.permute.xlu2 %v734_v2 }
  0x1e   : > { %232 = vperm.xlu1 %643, %v221_v10   ;;  %237 = vperm.xlu2 %644, %v222_v46  }
  0x21   : > { %v252_v3 = vld [vmem:[#allocation2] sm:$0xff] }
  0x22   : > { %v253_v5 = vmul.f32 0.125, %v252_v3 }
  0x8f   : > { %v228_v6 = vpop.permute.xlu0 %227 }
  0x90   : > { %v248_v7 = vmul.f32 %v832_v4, %v228_v6  ;;  %v233_v39 = vpop.permute.xlu1 %232 }
  0x91   : > { %v249_v41 = vmul.f32 %v832_v4, %v233_v39 }
  0x92   : > { %v254_v8 = vadd.f32 %v253_v5, %v248_v7 }
  0x94   : > { %v255_v9 = vmax.f32 %v254_v8, 0.0 }
  0x96   : > { %256 = vmax.xlane.f32.xlu0 %v255_v9 }
 0x109   : > { %v257_v11 = vpop.xlane.xlu0 %256 }
 0x10a   : > { %v258_v12 = vrot.slane %v257_v11, 4 }
 0x10c   : > { %v259_v13 = vmax.f32 %v257_v11, %v258_v12  ;;  %v238_v12 = vpop.permute.xlu2 %237 }
 0x10e   : > { %v260_v14 = vrot.slane %v259_v13, 2 }
 0x110   : > { %v261_v15 = vmax.f32 %v259_v13, %v260_v14  ;;  %v250_v14 = vmul.f32 %v832_v4, %v238_v12 }
 0x112   : > { %v262_v16 = vrot.slane %v261_v15, 1 }
 0x114   : > { %v263_v17 = vmax.f32 %v261_v15, %v262_v16 }
 0x116   : > { %535 = vpush %v263_v17 }
 0x147   : > { %s536_s11 = spop %535 }
 0x148   : > { %s265_s18 = smul.f32 0.003921569, %s536_s11 }
 0x14a   : > { %s266_s21 = smax.f32 %s735_s19, %s265_s18 }
 0x14b   : > { %v267_v18 = vstv %s266_s21 }
 0x14c   : > { %646 = vrcp.f32 %v267_v18  ;;  %v279_v22 = vand.u32 2147483648, %v267_v18  ;;  %v277_v24 = vand.u32 2147483647, %v267_v18  ;;  %vm273_vm1 = vweird.f32 %v267_v18 }
 0x14e   : > { %v280_v26 = vor.u32 1.1754944e-38, %v279_v22  ;;  %vm278_vm3 = vcmp.eq.f32.partialorder %v277_v24, 8.507059e+37 }
 0x152   : > { %v647_v19 = vpop.eup %646 }
 0x153   : > { %v269_v20 = vmul.f32 %v647_v19, %v267_v18  ;;  %vm274_vm0 = vweird.f32 %v647_v19 }
 0x154   : > { %vm275_vm2 = vmor %vm273_vm1, %vm274_vm0 }
 0x155   : > { %v270_v21 = vsub.f32 1.0, %v269_v20 }
 0x157   : > { %v271_v23 = vmul.f32 %v647_v19, %v270_v21 }
 0x159   : > { %v272_v25 = vadd.f32 %v647_v19, %v271_v23 }
 0x15b   : > { %v276_v27 = vsel %vm275_vm2, %v647_v19, %v272_v25  ;;  %v223_v19 = vld [vmem:[%s820_s5 + $0x18] sm:$0xff] }
 0x15c   : > { %v281_v28 = vsel %vm278_vm3, %v280_v26, %v276_v27 }
 0x15d   : > { %537 = vpush %v281_v28 }
 0x18e   : > { %s538_s23 = spop %537 }
 0x18f   : > { %v283_v29 = vstv %s538_s23 }
 0x190   : > { %v284_v30 = vmul.f32 %v283_v29, %v255_v9 }
 0x192   : > { %v541_v31 = vcvt.f32.s32 %v284_v30  ;;  %v539_v33 = vand.u32 2147483647, %v284_v30  ;;  %v544_v35 = vand.u32 2147483648, %v284_v30 }
 0x194   : > { %v542_v32 = vcvt.s32.f32 %v541_v31  ;;  %vm540_vm4 = vcmp.lt.f32.partialorder %v539_v33, 8388608.0 }
 0x196   : > { %v543_v34 = vand.u32 2147483647, %v542_v32 }
 0x198   : > { %v545_v36 = vor.u32 %v544_v35, %v543_v34 }
 0x19a   : > { %v546_v37 = vsel %vm540_vm4, %v545_v36, %v284_v30 }
 0x19b   : > { %v286_v38 = vmax.f32 %v546_v37, 0.0 }
 0x19d   : > { %v287_v40 = vmin.f32 %v286_v38, 255.0 }
 0x19f   : > { %v289_v42 = vmul.f32 %v287_v40, %v267_v18 }
 0x1a1   : > { %v291_v43 = vmul.f32 0.125, %v289_v42  ;;  %290 = vst [vmem:[%s822_s6] sm:$0xff] %v289_v42 }
 0x1a3   : > { %v292_v44 = vadd.f32 %v291_v43, %v249_v41 }
 0x1a5   : > { %v293_v45 = vmax.f32 %v292_v44, 0.0 }
 0x1a7   : > { %294 = vmax.xlane.f32.xlu1 %v293_v45 }
 0x21a   : > { %v295_v47 = vpop.xlane.xlu1 %294 }
 0x21b   : > { %v296_v48 = vrot.slane %v295_v47, 4 }
 0x21d   : > { %v297_v49 = vmax.f32 %v295_v47, %v296_v48 }
 0x21f   : > { %v298_v50 = vrot.slane %v297_v49, 2 }
 0x221   : > { %v299_v51 = vmax.f32 %v297_v49, %v298_v50 }
 0x223   : > { %v300_v52 = vrot.slane %v299_v51, 1 }
 0x225   : > { %v301_v53 = vmax.f32 %v299_v51, %v300_v52 }
 0x227   : > { %547 = vpush %v301_v53 }
 0x258   : > { %s548_s27 = spop %547 }
 0x259   : > { %s303_s28 = smul.f32 0.003921569, %s548_s27 }
 0x25b   : > { %s304_s29 = smax.f32 %s735_s19, %s303_s28  ;;  %s423_s28 = sshll.u32 %s822_s6, 4  ;;  %s424_s28 = int_to_ptr.vmem [resolvable:$true] %s423_s28 }
 0x25c   : > { %v305_v54 = vstv %s304_s29 }
 0x25d   : > { %648 = vrcp.f32 %v305_v54  ;;  %v317_v58 = vand.u32 2147483648, %v305_v54  ;;  %v315_v60 = vand.u32 2147483647, %v305_v54  ;;  %vm311_vm6 = vweird.f32 %v305_v54 }
 0x25f   : > { %v318_v62 = vor.u32 1.1754944e-38, %v317_v58  ;;  %vm316_vm8 = vcmp.eq.f32.partialorder %v315_v60, 8.507059e+37 }
 0x263   : > { %v649_v55 = vpop.eup %648 }
 0x264   : > { %v307_v56 = vmul.f32 %v649_v55, %v305_v54  ;;  %vm312_vm5 = vweird.f32 %v649_v55 }
 0x265   : > { %vm313_vm7 = vmor %vm311_vm6, %vm312_vm5 }
 0x266   : > { %v308_v57 = vsub.f32 1.0, %v307_v56 }
 0x268   : > { %v309_v59 = vmul.f32 %v649_v55, %v308_v57 }
 0x26a   : > { %v310_v61 = vadd.f32 %v649_v55, %v309_v59 }
 0x26c   : > { %v314_v63 = vsel %vm313_vm7, %v649_v55, %v310_v61 }
 0x26d   : > { %v319_v0 = vsel %vm316_vm8, %v318_v62, %v314_v63 }
 0x26e   : > { %549 = vpush %v319_v0 }
 0x29f   : > { %s550_s30 = spop %549 }
 0x2a0   : > { %v321_v1 = vstv %s550_s30 }
 0x2a1   : > { %v322_v2 = vmul.f32 %v321_v1, %v293_v45 }
 0x2a3   : > { %v553_v3 = vcvt.f32.s32 %v322_v2  ;;  %v551_v6 = vand.u32 2147483647, %v322_v2  ;;  %v556_v8 = vand.u32 2147483648, %v322_v2 }
 0x2a5   : > { %v554_v5 = vcvt.s32.f32 %v553_v3  ;;  %vm552_vm9 = vcmp.lt.f32.partialorder %v551_v6, 8388608.0 }
 0x2a7   : > { %v555_v7 = vand.u32 2147483647, %v554_v5 }
 0x2a9   : > { %v557_v9 = vor.u32 %v556_v8, %v555_v7 }
 0x2ab   : > { %v558_v10 = vsel %vm552_vm9, %v557_v9, %v322_v2 }
 0x2ac   : > { %v324_v11 = vmax.f32 %v558_v10, 0.0 }
 0x2ae   : > { %v325_v13 = vmin.f32 %v324_v11, 255.0 }
 0x2b0   : > { %v327_v15 = vmul.f32 %v325_v13, %v305_v54 }
 0x2b2   : > { %v330_v16 = vmul.f32 0.125, %v327_v15  ;;  %526 = vst [vmem:[%s822_s6 + $0x8] sm:$0xff] %v327_v15 }
 0x2b4   : > { %v331_v17 = vadd.f32 %v330_v16, %v250_v14 }
 0x2b6   : > { %v332_v18 = vmax.f32 %v331_v17, 0.0 }
 0x2b8   : > { %333 = vmax.xlane.f32.xlu2 %v332_v18 }
 0x2d0   : > { %242 = vperm.xlu2 %644, %v223_v19  }
 0x32b   : > { %v334_v20 = vpop.xlane.xlu2 %333 }
 0x32c   : > { %v335_v21 = vrot.slane %v334_v20, 4 }
 0x32e   : > { %v336_v22 = vmax.f32 %v334_v20, %v335_v21 }
 0x330   : > { %v337_v23 = vrot.slane %v336_v22, 2 }
 0x332   : > { %v338_v24 = vmax.f32 %v336_v22, %v337_v23 }
 0x333   : > { %v243_v49 = vpop.permute.xlu2 %242 }
 0x334   : > { %v339_v25 = vrot.slane %v338_v24, 1  ;;  %v251_v51 = vmul.f32 %v832_v4, %v243_v49 }
 0x336   : > { %v340_v26 = vmax.f32 %v338_v24, %v339_v25 }
 0x338   : > { %559 = vpush %v340_v26 }
 0x369   : > { %s560_s4 = spop %559 }
 0x36a   : > { %s342_s7 = smul.f32 0.003921569, %s560_s4 }
 0x36c   : > { %s343_s8 = smax.f32 %s735_s19, %s342_s7 }
 0x36d   : > { %v344_v27 = vstv %s343_s8 }
 0x36e   : > { %650 = vrcp.f32 %v344_v27  ;;  %v356_v31 = vand.u32 2147483648, %v344_v27  ;;  %v354_v33 = vand.u32 2147483647, %v344_v27  ;;  %vm350_vm11 = vweird.f32 %v344_v27 }
 0x370   : > { %v357_v35 = vor.u32 1.1754944e-38, %v356_v31  ;;  %vm355_vm13 = vcmp.eq.f32.partialorder %v354_v33, 8.507059e+37 }
 0x374   : > { %v651_v28 = vpop.eup %650 }
 0x375   : > { %v346_v29 = vmul.f32 %v651_v28, %v344_v27  ;;  %vm351_vm10 = vweird.f32 %v651_v28 }
 0x376   : > { %vm352_vm12 = vmor %vm350_vm11, %vm351_vm10 }
 0x377   : > { %v347_v30 = vsub.f32 1.0, %v346_v29 }
 0x379   : > { %v348_v32 = vmul.f32 %v651_v28, %v347_v30 }
 0x37b   : > { %v349_v34 = vadd.f32 %v651_v28, %v348_v32 }
 0x37d   : > { %v353_v36 = vsel %vm352_vm12, %v651_v28, %v349_v34 }
 0x37e   : > { %v358_v37 = vsel %vm355_vm13, %v357_v35, %v353_v36 }
 0x37f   : > { %561 = vpush %v358_v37 }
 0x3b0   : > { %s562_s5 = spop %561 }
 0x3b1   : > { %v360_v38 = vstv %s562_s5  ;;  %s674_s5 = scalar_lea.hbm %s891_s3, 96 }
 0x3b2   : > { %v361_v39 = vmul.f32 %v360_v38, %v332_v18 }
 0x3b4   : > { %v565_v40 = vcvt.f32.s32 %v361_v39  ;;  %v563_v42 = vand.u32 2147483647, %v361_v39  ;;  %v568_v44 = vand.u32 2147483648, %v361_v39 }
 0x3b6   : > { %v566_v41 = vcvt.s32.f32 %v565_v40  ;;  %vm564_vm14 = vcmp.lt.f32.partialorder %v563_v42, 8388608.0 }
 0x3b8   : > { %v567_v43 = vand.u32 2147483647, %v566_v41 }
 0x3ba   : > { %v569_v45 = vor.u32 %v568_v44, %v567_v43 }
 0x3bc   : > { %v570_v46 = vsel %vm564_vm14, %v569_v45, %v361_v39 }
 0x3bd   : > { %v363_v47 = vmax.f32 %v570_v46, 0.0 }
 0x3bf   : > { %v364_v48 = vmin.f32 %v363_v47, 255.0 }
 0x3c1   : > { %v366_v50 = vmul.f32 %v364_v48, %v344_v27 }
 0x3c3   : > { %527 = vst [vmem:[%s822_s6 + $0x10] sm:$0xff] %v366_v50  ;;  %v369_v52 = vmul.f32 0.125, %v366_v50 }
 0x3c5   : > { %v370_v53 = vadd.f32 %v369_v52, %v251_v51 }
 0x3c7   : > { %v371_v54 = vmax.f32 %v370_v53, 0.0 }
 0x3c9   : > { %372 = vmax.xlane.f32.xlu0 %v371_v54 }
 0x43c   : > { %v373_v55 = vpop.xlane.xlu0 %372 }
 0x43d   : > { %v374_v56 = vrot.slane %v373_v55, 4 }
 0x43f   : > { %v375_v57 = vmax.f32 %v373_v55, %v374_v56 }
 0x441   : > { %v376_v58 = vrot.slane %v375_v57, 2 }
 0x443   : > { %v377_v59 = vmax.f32 %v375_v57, %v376_v58 }
 0x445   : > { %v378_v60 = vrot.slane %v377_v59, 1 }
 0x447   : > { %v379_v61 = vmax.f32 %v377_v59, %v378_v60 }
 0x449   : > { %571 = vpush %v379_v61 }
 0x47a   : > { %s572_s9 = spop %571 }
 0x47b   : > { %s381_s10 = smul.f32 0.003921569, %s572_s9 }
 0x47d   : > { %s382_s11 = smax.f32 %s735_s19, %s381_s10  ;;  %s534_s19 = sshll.u32 %s724_s15, 5 }
 0x47e   : > { %v383_v62 = vstv %s382_s11  ;;  %s422_s27 = scalar_lea.hbm %s891_s3, %s534_s19  ;;  %s410_s15 = scalar_lea.sflag [#allocation4], %s197_s26 }
 0x47f   : > { %652 = vrcp.f32 %v383_v62  ;;  %v395_v1 = vand.u32 2147483648, %v383_v62  ;;  %v393_v3 = vand.u32 2147483647, %v383_v62  ;;  %vm389_vm0 = vweird.f32 %v383_v62  ;;  %s425_s29 = sshll.u32 %s422_s27, 4  ;;  %s426_s29 = int_to_ptr.hbm [resolvable:$true] %s425_s29 }
 0x480   : > { %s668_s30 = sshra.s32 %s426_s29, 4  ;;  %s669_s30 = int_to_ptr.hbm [resolvable:$true] %s668_s30 }
 0x481   : > { %v396_v6 = vor.u32 1.1754944e-38, %v395_v1  ;;  %vm394_vm2 = vcmp.eq.f32.partialorder %v393_v3, 8.507059e+37  ;;  %s670_s4 = scalar_lea.hbm %s669_s30, 32  ;;  %p675_p2 = scmp.lt.s32.totalorder %s669_s30, %s891_s3 }
 0x482   : > { %p671_p13 = scmp.ne.s32.totalorder %s669_s30, %s670_s4  ;;  %p676_p3 = scmp.lt.s32.totalorder %s674_s5, %s670_s4 }
 0x484   : > { %p672_p0 = pnand %p671_p13, %p798_p4  ;;  %p677_p5 = por %p676_p3, %p675_p2 }
 0x485   : > { %v653_v4 = vpop.eup %652 }
 0x486   : > { %v385_v63 = vmul.f32 %v653_v4, %v383_v62  ;;  %vm390_vm15 = vweird.f32 %v653_v4  ;;  %p673_p1 = pneg %p672_p0 }
 0x487   : > { %vm391_vm1 = vmor %vm389_vm0, %vm390_vm15 }
 0x488   : > { %v386_v0 = vsub.f32 1.0, %v385_v63  ;;  %p678_p6 = pnand %p677_p5, %p673_p1 }
 0x48a   : > { %v387_v2 = vmul.f32 %v653_v4, %v386_v0 }
 0x48c   : > { %v388_v5 = vadd.f32 %v653_v4, %v387_v2 }
 0x48e   : > { %v392_v7 = vsel %vm391_vm1, %v653_v4, %v388_v5 }
 0x48f   : > { %v397_v8 = vsel %vm394_vm2, %v396_v6, %v392_v7 }
 0x490   : > { %573 = vpush %v397_v8 }
 0x4c1   : > { %s574_s18 = spop %573 }
 0x4c2   : > { %v399_v9 = vstv %s574_s18 }
 0x4c3   : > { %v400_v10 = vmul.f32 %v399_v9, %v371_v54 }
 0x4c5   : > { %v577_v11 = vcvt.f32.s32 %v400_v10  ;;  %v575_v13 = vand.u32 2147483647, %v400_v10  ;;  %v580_v15 = vand.u32 2147483648, %v400_v10 }
 0x4c7   : > { %v578_v12 = vcvt.s32.f32 %v577_v11  ;;  %vm576_vm3 = vcmp.lt.f32.partialorder %v575_v13, 8388608.0 }
 0x4c9   : > { %v579_v14 = vand.u32 2147483647, %v578_v12 }
 0x4cb   : > { %v581_v16 = vor.u32 %v580_v15, %v579_v14 }
 0x4cd   : > { %v582_v17 = vsel %vm576_vm3, %v581_v16, %v400_v10 }
 0x4ce   : > { %v402_v18 = vmax.f32 %v582_v17, 0.0 }
 0x4d0   : > { %v403_v19 = vmin.f32 %v402_v18, 255.0 }
 0x4d2   : > { %v405_v20 = vmul.f32 %v403_v19, %v383_v62 }
 0x4d4   : > { %528 = vst [vmem:[%s822_s6 + $0x18] sm:$0xff] %v405_v20 }
 0x4d5   : > { %408 = vst [vmem:[#allocation2] sm:$0xff] %v405_v20 }
 0x4d6   : > { %681 = shalt.err (!%p678_p6)
}
 0x4d7   : > { %s736_s26 = smov 128   ;;  %s737_s6 = smov 8  }
 0x4d8   : > { %583 = dma.vmem_to_hbm [thread:$0]  (%p798_p4), %s424_s28, 512, %s426_s29, %s410_s15, %s736_s26, %s736_s26, %s737_s6  }
 0x4d9 PF: > { %p589_p7 = scmp.ge.s32.totalorder %s732_s17, 2  ;;  %s440_s11 = sand.u32 1, %s712_s12  }
 0x4da   : > { %s441_s18 = scalar_lea.sflag [#allocation4], %s440_s11 }
 0x4db   : > { %p586_p9 = pnand %p589_p7, %p805_p8 }
 0x4dd   : > { %p587_p10 = pneg %p586_p9 }
 0x4df   : > { %707 = dma.done.wait (%p587_p10), %s441_s18, 512  }
 0x4e0   : > { %709 = vsyncadd (%p587_p10), %s441_s18, 4294966784  ;;  %s16_s17 = sadd.s32 1, %s732_s17   ;;  %s894_s12 = smov %s716_s13 }
 0x4e1   : > { %p13_p11 = scmp.ge.s32.totalorder %s16_s17, 5   ;;  %s895_s13 = smov %s720_s14 }
 0x4e2   : > { %s896_s14 = smov %s811_s25  ;;  %s897_s15 = smov %s728_s16 }
 0x4e3   : > { %s898_s16 = smov %s900_s20  ;;  %15 = sbr.rel (!%p13_p11) target bundleno = 4 (0x4), region = 77 }
 0x4e8   :  { %447 = vsyncpa [#allocation4], 1 }
 0x4e9   :  { %449 = vsyncpa [#allocation4 + $0x1], 1 }

</bundles_post_ra>
